<compile_context>
chip_gen: v5e
topology: v5e:2x2
jax: 0.10.0
libtpu: 0.0.40
codegen_flags: <defaults>
</compile_context>

<pallas_src>
import functools
import math

import jax
import jax.numpy as jnp
from jax.experimental import pallas as pl
from jax.experimental.pallas import tpu as pltpu


# ----------------------------------------------------------------------------- kernels

def _sin_emb_iota_kernel(a_ref, b_ref, out_ref):
    """arange-positions path with k-way row folding.

    a_ref : (1, k*dim) f32   a[l] = k * inv_freq[(l % dim) % half]
    b_ref : (1, k*dim) f32   b[l] = (l // dim) * inv_freq[(l % dim) % half]
                                     + (pi/2 if (l % dim) >= half else 0)
    out_ref: (tile_r, k*dim) out[r, l] = sin(row_abs * a[l] + b[l])
             which equals emb[row_abs*k + l//dim, l % dim] of the reference.
    """
    tile_r, kd = out_ref.shape
    row = jax.lax.broadcasted_iota(jnp.int32, (tile_r, kd), 0)
    row = row + pl.program_id(0) * tile_r                      # absolute folded row
    arg = row.astype(jnp.float32) * a_ref[...] + b_ref[...]    # single VPU FMA
    out_ref[...] = jnp.sin(arg).astype(out_ref.dtype)          # one EUP op / element


def _sin_emb_pos_kernel(pos_ref, inv_ref, phase_ref, out_ref):
    """explicit-positions path.

    pos_ref   : (tile_r, 1) f32
    inv_ref   : (1, dim)    f32   inv_freq[c % half]
    phase_ref : (1, dim)    f32   pi/2 where c >= half (cos half), else 0
    """
    arg = pos_ref[...] * inv_ref[...] + phase_ref[...]         # (tile_r, dim)
    out_ref[...] = jnp.sin(arg).astype(out_ref.dtype)


# ----------------------------------------------------------------------------- helpers

def _pick_tile_rows(rows: int, lane_width: int,
                    itemsize: int = 4, target_bytes: int = 2 << 20) -> int:
    """Row tile: full row count, or a multiple of 8 giving ~2 MiB per buffer."""
    t = max(8, (target_bytes // (lane_width * itemsize)) // 8 * 8)
    return rows if t >= rows else t


_COMPILER_PARAMS = pltpu.CompilerParams(
    dimension_semantics=("parallel",),         # rows are independent
    vmem_limit_bytes=32 * 1024 * 1024,         # headroom over v5e's 16 MiB default
)

_HALF_PI = math.pi / 2.0


# ----------------------------------------------------------------------------- wrappers

@functools.partial(jax.jit, static_argnums=0, static_argnames=("out_dtype",))
def sinusoidal_embedding_arange(n: int, inv_freq: jax.Array,
                                *, out_dtype=jnp.float32) -> jax.Array:
    """emb for pos = arange(n); positions generated in-kernel (no pos DMA)."""
    h = inv_freq.shape[0]
    dim = 2 * h
    k = 128 // math.gcd(dim, 128)              # smallest k with (k*dim) % 128 == 0
    kd = k * dim
    rows = -(-n // k)                          # folded rows (ceil)
    n_pad = rows * k
    tile_r = _pick_tile_rows(rows, kd)

    lane = jnp.arange(kd, dtype=jnp.int32)
    c = lane % dim                                              # column in embedding
    inv_lane = inv_freq.astype(jnp.float32)[c % h]              # (kd,)
    phase = jnp.where(c >= h, jnp.float32(_HALF_PI), jnp.float32(0.0))
    a_row = (jnp.float32(k) * inv_lane).reshape(1, kd)
    b_row = ((lane // dim).astype(jnp.float32) * inv_lane + phase).reshape(1, kd)

    out_folded = pl.pallas_call(
        _sin_emb_iota_kernel,
        out_shape=jax.ShapeDtypeStruct((rows, kd), out_dtype),
        grid=(pl.cdiv(rows, tile_r),),
        in_specs=[
            pl.BlockSpec((1, kd), lambda i: (0, 0)),   # resident frequency row
            pl.BlockSpec((1, kd), lambda i: (0, 0)),   # resident offset+phase row
        ],
        out_specs=pl.BlockSpec((tile_r, kd), lambda i: (i, 0)),
        compiler_params=_COMPILER_PARAMS,
    )(a_row, b_row)

    # (rows, k*dim) -> (n_pad, dim): pure row-major unfold (no data reorder).
    out = out_folded.reshape(n_pad, dim)
    return out if n_pad == n else out[:n]


@functools.partial(jax.jit, static_argnames=("out_dtype",))
def sinusoidal_embedding(pos: jax.Array, inv_freq: jax.Array,
                         *, out_dtype=jnp.float32) -> jax.Array:
    """emb for user-supplied positions: pos (N,) -> (N, 2*half_dim)."""
    pos = jnp.asarray(pos, jnp.float32)
    n = pos.shape[0]
    h = inv_freq.shape[0]
    dim = 2 * h
    tile_r = _pick_tile_rows(n, dim)

    c = jnp.arange(dim, dtype=jnp.int32)
    inv_row = inv_freq.astype(jnp.float32)[c % h].reshape(1, dim)
    phase_row = jnp.where(c >= h, jnp.float32(_HALF_PI),
                          jnp.float32(0.0)).reshape(1, dim)
    pos2d = pos.reshape(n, 1)

    # TODO(synk): for huge N with dim < 128, fold positions here too (needs an
    # in-kernel lane replication of pos) to make the store fully lane-dense.
    return pl.pallas_call(
        _sin_emb_pos_kernel,
        out_shape=jax.ShapeDtypeStruct((n, dim), out_dtype),
        grid=(pl.cdiv(n, tile_r),),
        in_specs=[
            pl.BlockSpec((tile_r, 1), lambda i: (i, 0)),   # pos column (lane-padded)
            pl.BlockSpec((1, dim), lambda i: (0, 0)),      # resident frequencies
            pl.BlockSpec((1, dim), lambda i: (0, 0)),      # resident phase row
        ],
        out_specs=pl.BlockSpec((tile_r, dim), lambda i: (i, 0)),
        compiler_params=_COMPILER_PARAMS,
    )(pos2d, inv_row, phase_row)


class SinusoidalEmbedding:
    """JAX/Pallas port of the PyTorch SinusoidalEmbedding module."""

    def __init__(self, dim: int, theta: int = 10000):
        assert dim % 2 == 0
        self.dim = dim
        half_dim = dim // 2
        freq_seq = jnp.arange(half_dim, dtype=jnp.float32) / half_dim
        self.inv_freq = jnp.exp(-math.log(theta) * freq_seq)   # (half_dim,)

    def __call__(self, pos=None, x=None):
        assert (pos is not None) or (x is not None)
        if pos is None:
            # pos = arange(x.shape[1]) — generate positions inside the kernel.
            return sinusoidal_embedding_arange(int(x.shape[1]), self.inv_freq)
        return sinusoidal_embedding(pos, self.inv_freq)


# ----------------------------------------------------------------------------- demo

if __name__ == "__main__":
    key = jax.random.PRNGKey(0)

    dim = 32        # embedding dim (even), half_dim = 16
    batch = 2
    seq = 8
    feat = 4

    # x only supplies the sequence length (pos = arange(x.shape[1])), as in torch.
    x = jax.random.normal(key, (batch, seq, feat), dtype=jnp.float32)

    module = SinusoidalEmbedding(dim=dim, theta=10000)

    # --- pos=None path (in-kernel iota, lane-dense folded store) ---
    emb = jax.block_until_ready(module(x=x))            # (seq, dim)
    pos_ref = jnp.arange(seq, dtype=jnp.float32)
    e = pos_ref[:, None] * module.inv_freq[None, :]
    ref = jnp.concatenate([jnp.sin(e), jnp.cos(e)], axis=-1)
    assert emb.shape == (seq, dim), emb.shape
    assert emb.dtype == jnp.float32
    assert jnp.allclose(emb, ref, atol=1e-5, rtol=1e-5)

    # --- explicit-pos path ---
    pos = jax.random.uniform(jax.random.PRNGKey(1), (seq,),
                             minval=0.0, maxval=50.0, dtype=jnp.float32)
    emb2 = jax.block_until_ready(module(pos=pos))       # (seq, dim)
    e2 = pos[:, None] * module.inv_freq[None, :]
    ref2 = jnp.concatenate([jnp.sin(e2), jnp.cos(e2)], axis=-1)
    assert emb2.shape == (seq, dim)
    assert jnp.allclose(emb2, ref2, atol=1e-5, rtol=1e-5)

    print("KERNEL_OK")
</pallas_src>

<mosaic_0001>
module attributes {stable_mosaic.version = 11 : i64} {
  func.func @_sin_emb_iota_kernel(%arg0: i32, %arg1: memref<1x128xf32, #tpu.memory_space<vmem>>, %arg2: memref<1x128xf32, #tpu.memory_space<vmem>>, %arg3: memref<2x128xf32, #tpu.memory_space<vmem>>) attributes {dimension_semantics = [#tpu.dimension_semantics<parallel>], iteration_bounds = array<i64: 1>, scalar_prefetch = 0 : i64, scratch_operands = 0 : i64, tpu.core_type = #tpu.core_type<tc>, window_params = [{pipeline_mode = #tpu.pipeline_mode<synchronous>, transform_indices = @transform_0, window_bounds = array<i64: 1, 128>}, {pipeline_mode = #tpu.pipeline_mode<synchronous>, transform_indices = @transform_1, window_bounds = array<i64: 1, 128>}, {transform_indices = @transform_2, window_bounds = array<i64: 2, 128>}]} {
    %0 = tpu.iota {dimensions = array<i32: 0>} : vector<2x128xi32>
    %c2_i32 = arith.constant 2 : i32
    %1 = arith.muli %arg0, %c2_i32 : i32
    %2 = vector.broadcast %1 : i32 to vector<2x128xi32>
    %3 = arith.addi %0, %2 : vector<2x128xi32>
    %4 = arith.sitofp %3 : vector<2x128xi32> to vector<2x128xf32>
    %c0 = arith.constant 0 : index
    %c0_0 = arith.constant 0 : index
    %5 = vector.load %arg1[%c0, %c0_0] : memref<1x128xf32, #tpu.memory_space<vmem>>, vector<1x128xf32>
    %6 = vector.broadcast %5 : vector<1x128xf32> to vector<2x128xf32>
    %7 = arith.mulf %4, %6 : vector<2x128xf32>
    %c0_1 = arith.constant 0 : index
    %c0_2 = arith.constant 0 : index
    %8 = vector.load %arg2[%c0_1, %c0_2] : memref<1x128xf32, #tpu.memory_space<vmem>>, vector<1x128xf32>
    %9 = vector.broadcast %8 : vector<1x128xf32> to vector<2x128xf32>
    %10 = arith.addf %7, %9 : vector<2x128xf32>
    %11 = math.sin %10 : vector<2x128xf32>
    %c0_3 = arith.constant 0 : index
    %c0_4 = arith.constant 0 : index
    %12 = vector.load %arg3[%c0_3, %c0_4] : memref<2x128xf32, #tpu.memory_space<vmem>>, vector<2x128xf32>
    tpu.vector_store %arg3[%c0_3, %c0_4], %11 {strides = array<i32>} : memref<2x128xf32, #tpu.memory_space<vmem>>, vector<2x128xf32>,
    return
  }
  func.func @transform_0(%arg0: i32) -> (i32, i32) {
    %c0_i32 = arith.constant 0 : i32
    %c0_i32_0 = arith.constant 0 : i32
    %c0_i32_1 = arith.constant 0 : i32
    return %c0_i32, %c0_i32_0 : i32, i32
  }
  func.func @transform_1(%arg0: i32) -> (i32, i32) {
    %c0_i32 = arith.constant 0 : i32
    %c0_i32_0 = arith.constant 0 : i32
    %c0_i32_1 = arith.constant 0 : i32
    return %c0_i32, %c0_i32_0 : i32, i32
  }
  func.func @transform_2(%arg0: i32) -> (i32, i32) {
    %c0_i32 = arith.constant 0 : i32
    %c0_i32_0 = arith.constant 0 : i32
    return %arg0, %c0_i32 : i32, i32
  }
}

</mosaic_0001>

<bundles_post_ra>
// kernel: sinusoidal_embedding_arange.1
= control target key start
LH: loop header
LB: loop body
LE: loop exit
PB: predicated region body
PF: predicated region fallthrough
CT: control target
= control target key end

     0   :  { %v11_v0 = vlaneseq  ;;  %v199_v18 = vmov 683565275   ;;  %v200_v20 = vmov 2475754826   ;;  %v201_v22 = vmov 2131351028   ;;  %s276_s0 = inlined_call_operand.vmem [shape: f32[1,128], index: 0, kind: input, shape index: {}]   ;;  %s277_s1 = inlined_call_operand.vmem [shape: f32[1,128], index: 1, kind: input, shape index: {}]   ;;  %s278_s2 = inlined_call_operand.vmem [shape: f32[2,128], index: 2, kind: output, shape index: {}]  }
   0x1   :  { %v197_v2 = vld [vmem:[%s276_s0] ss:$0 sm:$0xff]  ;;  %v202_v24 = vmov 2102212464   ;;  %v203_v26 = vmov 920167782  }
   0x2   :  { %v12_v1 = vshrl.u32 %v11_v0, 7  ;;  %v198_v4 = vld [vmem:[%s277_s1] ss:$0 sm:$0xff]  ;;  %v204_v32 = vmov 1326507024  }
   0x4   :  { %v16_v3 = vcvt.s32.f32 %v12_v1 }
   0x6   :  { %v21_v5 = vmul.f32 %v197_v2, %v16_v3 }
   0x8   :  { %v227_v6 = vadd.f32 %v198_v4, %v21_v5 }
   0xa   :  { %v30_v7 = vand.u32 2139095040, %v227_v6  ;;  %v27_v9 = vand.u32 2147483647, %v227_v6  ;;  %vm29_vm12 = vcmp.lt.s32.totalorder %v227_v6, 0 }
   0xc   :  { %v31_v8 = vshrl.u32 %v30_v7, 23  ;;  %v34_v12 = vand.u32 8388607, %v27_v9  ;;  %v205_v7 = vmov 0   ;;  %vm28_vm13 = vcmp.le.f32.partialorder %v27_v9, 0.7853982 }
   0xe   :  { %v187_v10 = vadd.s32 4294967169, %v31_v8  ;;  %v35_v15 = vor.u32 8388608, %v34_v12 }
  0x10   :  { %v37_v11 = vadd.s32 1, %v187_v10  ;;  %v236_v34 = vshll.u32 %v35_v15, 8 }
  0x12   :  { %vm38_vm0 = vcmp.gt.s32.totalorder %v37_v11, 0  ;;  %v76_v46 = vand.u32 65535, %v236_v34  ;;  %v77_v47 = vshrl.u32 %v236_v34, 16 }
  0x13   :  { %v39_v13 = vsel %vm38_vm0, %v37_v11, 0 }
  0x14   :  { %v41_v14 = vand.u32 31, %v39_v13  ;;  %v233_v16 = vshrl.u32 %v39_v13, 5 }
  0x16   :  { %v42_v17 = vsub.s32 32, %v41_v14  ;;  %v44_v19 = vshll.u32 %v199_v18, %v41_v14  ;;  %v47_v21 = vshll.u32 %v200_v20, %v41_v14  ;;  %v50_v23 = vshll.u32 %v201_v22, %v41_v14 }
  0x17   :  { %v53_v25 = vshll.u32 %v202_v24, %v41_v14  ;;  %v56_v27 = vshll.u32 %v203_v26, %v41_v14  ;;  %vm59_vm1 = vcmp.lt.s32.totalorder %v233_v16, 1  ;;  %vm62_vm2 = vcmp.lt.s32.totalorder %v233_v16, 4 }
  0x18   :  { %v45_v28 = vshrl.u32 %v200_v20, %v42_v17  ;;  %v48_v29 = vshrl.u32 %v201_v22, %v42_v17  ;;  %v51_v30 = vshrl.u32 %v202_v24, %v42_v17  ;;  %v54_v31 = vshrl.u32 %v203_v26, %v42_v17 }
  0x19   :  { %v57_v33 = vshrl.u32 %v204_v32, %v42_v17  ;;  %vm61_vm3 = vcmp.lt.s32.totalorder %v233_v16, 3  ;;  %vm60_vm4 = vcmp.lt.s32.totalorder %v233_v16, 2  ;;  %v43_v54 = vshrl.u32 %v199_v18, %v42_v17 }
  0x1a   :  { %v46_v35 = vor.u32 %v45_v28, %v44_v19  ;;  %v49_v36 = vor.u32 %v48_v29, %v47_v21  ;;  %v52_v37 = vor.u32 %v51_v30, %v50_v23  ;;  %v55_v38 = vor.u32 %v54_v31, %v53_v25 }
  0x1b   :  { %v58_v39 = vor.u32 %v57_v33, %v56_v27 }
  0x1c   :  { %v67_v40 = vsel %vm59_vm1, %v46_v35, %v49_v36  ;;  %v71_v41 = vsel %vm59_vm1, %v49_v36, %v52_v37  ;;  %v68_v42 = vsel %vm62_vm2, %v55_v38, 920167782  ;;  %v63_v3 = vsel %vm59_vm1, %v43_v54, %v46_v35 }
  0x1d   :  { %v72_v43 = vsel %vm62_vm2, %v58_v39, 1326507024  ;;  %v69_v44 = vsel %vm61_vm3, %v52_v37, %v68_v42  ;;  %v64_v5 = vsel %vm62_vm2, %v52_v37, 2102212464  ;;  %vm170_vm1 = vweird.f32 %v227_v6 }
  0x1e   :  { %v73_v45 = vsel %vm61_vm3, %v55_v38, %v72_v43  ;;  %v70_v48 = vsel %vm60_vm4, %v67_v40, %v69_v44  ;;  %v65_v18 = vsel %vm61_vm3, %v49_v36, %v64_v5 }
  0x1f   :  { %v74_v49 = vsel %vm60_vm4, %v71_v41, %v73_v45  ;;  %v100_v52 = vand.u32 65535, %v70_v48  ;;  %v101_v53 = vshrl.u32 %v70_v48, 16  ;;  %v66_v26 = vsel %vm60_vm4, %v63_v3, %v65_v18 }
  0x20   :  { %v78_v50 = vand.u32 65535, %v74_v49  ;;  %v79_v51 = vshrl.u32 %v74_v49, 16  ;;  %v120_v30 = vmul.u32 %v236_v34, %v66_v26 }
  0x21   :  { %v102_v58 = vmul.u32 %v100_v52, %v76_v46  ;;  %v103_v59 = vmul.u32 %v101_v53, %v76_v46  ;;  %v104_v60 = vmul.u32 %v100_v52, %v77_v47  ;;  %v105_v0 = vmul.u32 %v101_v53, %v77_v47 }
  0x22   :  { %v80_v55 = vmul.u32 %v78_v50, %v76_v46  ;;  %v81_v56 = vmul.u32 %v79_v51, %v76_v46  ;;  %v82_v57 = vmul.u32 %v78_v50, %v77_v47  ;;  %v83_v61 = vmul.u32 %v79_v51, %v77_v47 }
  0x23   :  { %v106_v1 = vshll.u32 %v103_v59, 16  ;;  %v108_v2 = vshll.u32 %v104_v60, 16  ;;  %v107_v15 = vshrl.u32 %v103_v59, 16  ;;  %v109_v22 = vshrl.u32 %v104_v60, 16 }
  0x24   :  { %v84_v62 = vshll.u32 %v81_v56, 16  ;;  %v86_v63 = vshll.u32 %v82_v57, 16  ;;  %v85_v11 = vshrl.u32 %v81_v56, 16  ;;  %v87_v19 = vshrl.u32 %v82_v57, 16 }
  0x25   :  { %vm110_vm6 = vc.u32 %v102_v58, %v106_v1  ;;  %v112_v10 = vadd.s32 %v106_v1, %v102_v58 }
  0x26   :  { %vm88_vm5 = vc.u32 %v80_v55, %v84_v62  ;;  %v90_v4 = vadd.s32 %v84_v62, %v80_v55  ;;  %v111_v13 = vsel %vm110_vm6, 1, %v205_v7 }
  0x27   :  { %v89_v8 = vsel %vm88_vm5, 1, %v205_v7  ;;  %v113_v17 = vadd.s32 %v111_v13, %v105_v0  ;;  %vm114_vm8 = vc.u32 %v112_v10, %v108_v2  ;;  %v116_v25 = vadd.s32 %v112_v10, %v108_v2 }
  0x28   :  { %v91_v12 = vadd.s32 %v89_v8, %v83_v61  ;;  %vm92_vm7 = vc.u32 %v90_v4, %v86_v63  ;;  %v115_v21 = vsel %vm114_vm8, 1, %v205_v7 }
  0x29   :  { %v93_v14 = vsel %vm92_vm7, 1, %v205_v7  ;;  %v117_v23 = vadd.s32 %v115_v21, %v113_v17 }
  0x2a   :  { %v95_v20 = vadd.s32 %v93_v14, %v91_v12 }
  0x2b   :  { %v118_v27 = vadd.s32 %v117_v23, %v107_v15 }
  0x2c   :  { %v96_v24 = vadd.s32 %v95_v20, %v85_v11 }
  0x2d   :  { %v119_v29 = vadd.s32 %v118_v27, %v109_v22 }
  0x2e   :  { %v97_v28 = vadd.s32 %v96_v24, %v87_v19 }
  0x2f   :  { %v123_v31 = vadd.s32 1, %v119_v29 }
  0x30   :  { %vm122_vm9 = vc.u32 %v97_v28, %v116_v25  ;;  %v121_v16 = vadd.s32 %v116_v25, %v97_v28 }
  0x31   :  { %v124_v32 = vsel %vm122_vm9, %v123_v31, %v119_v29 }
  0x32   :  { %v125_v33 = vadd.s32 %v124_v32, %v120_v30 }
  0x34   :  { %v126_v35 = vadd.s32 536870912, %v125_v33 }
  0x36   :  { %v127_v36 = vshrl.u32 %v126_v35, 30 }
  0x38   :  { %v128_v37 = vshll.u32 %v127_v36, 30  ;;  %v151_v54 = vsub.s32 4, %v127_v36 }
  0x3a   :  { %v129_v38 = vsub.s32 %v125_v33, %v128_v37  ;;  %v152_v57 = vsel %vm29_vm12, %v151_v54, %v127_v36 }
  0x3b   :  { %v154_v60 = vsel %vm28_vm13, 0, %v152_v57 }
  0x3c   :  { %vm130_vm10 = vcmp.lt.s32.totalorder %v129_v38, 0  ;;  %v131_v39 = vsub.s32 0, %v129_v38  ;;  %v171_v1 = vadd.s32 3, %v154_v60 }
  0x3e   :  { %v132_v40 = vsel %vm130_vm10, %v131_v39, %v129_v38  ;;  %v172_v7 = vand.u32 3, %v171_v1 }
  0x3f   :  { %v133_v41 = vclz %v132_v40 }
  0x40   :  { %vm177_vm14 = vcmp.eq.s32.totalorder %v172_v7, 2  ;;  %vm174_vm15 = vcmp.eq.s32.totalorder %v172_v7, 0  ;;  %vm173_vm0 = vcmp.lt.s32.totalorder %v172_v7, 2 }
  0x41   :  { %v188_v42 = vadd.s32 4294967294, %v133_v41 }
  0x43   :  { %vm189_vm11 = vcmp.lt.s32.totalorder %v188_v42, 0 }
  0x44   :  { %v136_v43 = vsel %vm189_vm11, 0, %v188_v42 }
  0x45   :  { %v137_v44 = vsub.s32 32, %v136_v43  ;;  %v138_v45 = vshll.u32 %v129_v38, %v136_v43  ;;  %v141_v46 = vsub.s32 4294967266, %v136_v43 }
  0x47   :  { %v139_v34 = vshrl.u32 %v121_v16, %v137_v44  ;;  %v142_v47 = vadd.s32 127, %v141_v46 }
  0x49   :  { %v140_v48 = vor.u32 %v139_v34, %v138_v45  ;;  %v143_v49 = vshll.u32 %v142_v47, 23 }
  0x4b   :  { %v144_v50 = vor.u32 4788187, %v143_v49  ;;  %v147_v51 = vcvt.s32.f32 %v140_v48 }
  0x4d   :  { %v145_v52 = vand.u32 2147483647, %v144_v50 }
  0x4f   :  { %v148_v53 = vmul.f32 %v147_v51, %v145_v52 }
  0x51   :  { %v149_v55 = vxor.u32 2147483648, %v148_v53 }
  0x53   :  { %v150_v56 = vsel %vm29_vm12, %v149_v55, %v148_v53 }
  0x54   :  { %v153_v58 = vsel %vm28_vm13, %v227_v6, %v150_v56 }
  0x55   :  { %v155_v59 = vmul.f32 %v153_v58, %v153_v58 }
  0x57   :  { %v156_v61 = vmul.f32 -0.001358992, %v155_v59  ;;  %v163_v62 = vmul.f32 -0.00019511016, %v155_v59 }
  0x59   :  { %v157_v63 = vadd.f32 0.041655596, %v156_v61  ;;  %v164_v0 = vadd.f32 0.008332121, %v163_v62 }
  0x5b   :  { %v158_v2 = vmul.f32 %v157_v63, %v155_v59  ;;  %v165_v3 = vmul.f32 %v164_v0, %v155_v59 }
  0x5d   :  { %v159_v4 = vadd.f32 -0.4999988, %v158_v2  ;;  %v166_v5 = vadd.f32 -0.16666654, %v165_v3 }
  0x5f   :  { %v160_v8 = vmul.f32 %v159_v4, %v155_v59  ;;  %v167_v10 = vmul.f32 %v166_v5, %v155_v59 }
  0x61   :  { %v161_v9 = vadd.f32 1.0, %v160_v8  ;;  %v168_v11 = vadd.f32 1.0, %v167_v10 }
  0x63   :  { %v169_v12 = vmul.f32 %v168_v11, %v153_v58  ;;  %v178_v13 = vxor.u32 2147483648, %v161_v9 }
  0x65   :  { %v175_v14 = vxor.u32 2147483648, %v169_v12  ;;  %v179_v15 = vsel %vm177_vm14, %v178_v13, %v169_v12 }
  0x67   :  { %v176_v17 = vsel %vm174_vm15, %v161_v9, %v175_v14 }
  0x68   :  { %v180_v18 = vsel %vm173_vm0, %v176_v17, %v179_v15 }
  0x69   :  { %v181_v19 = vsel %vm170_vm1, nan, %v180_v18 }
  0x6a   :  { %182 = vst [vmem:[%s278_s2] sm:$0x3] %v181_v19 }

</bundles_post_ra>
